<compile_context>
chip_gen: v5e
topology: v5e:2x2
jax: 0.10.0
libtpu: 0.0.40
codegen_flags: <defaults>
</compile_context>

<pallas_src>
import functools
import math

import jax
import jax.numpy as jnp
from jax import lax
from jax.experimental import pallas as pl
from jax.experimental.pallas import tpu as pltpu


# --------------------------- Pallas matmul kernel -------------------------- #
def _conv_matmul_kernel(x_ref, w_ref, s_ref, b_ref, a_ref, o_ref, *, act):
    """out = act((patches @ W) * scale + shift), tiled over (M, K).

    x_ref : [tm, tk]  bf16 patches tile
    w_ref : [tk, Cp]  bf16 weight tile
    s_ref : [1, Cp]   f32 folded-BN scale
    b_ref : [1, Cp]   f32 folded-BN shift
    a_ref : [1, Cp]   f32 PReLU slope (ignored when act == "none")
    o_ref : [tm, Cp]  f32 output; resident across the K grid axis and used
                      directly as the accumulator (no extra VMEM scratch).
    """
    k = pl.program_id(1)

    @pl.when(k == 0)
    def _():
        o_ref[...] = jnp.zeros_like(o_ref)

    o_ref[...] += jnp.dot(x_ref[...], w_ref[...],
                          preferred_element_type=jnp.float32)

    @pl.when(k == pl.num_programs(1) - 1)
    def _():
        r = o_ref[...] * s_ref[...] + b_ref[...]
        if act == "prelu":
            r = jnp.where(r >= 0.0, r, a_ref[...] * r)
        o_ref[...] = r


def _round_up(x, m):
    return (x + m - 1) // m * m


def _pick_tk(k_pad):
    # prefer multiples of 256 (v7x 2x256^2 MXU), fall back to 128 (v5e/v6e ok)
    for cand in (512, 256, 128):
        if k_pad % cand == 0:
            return cand
    return k_pad


def _matmul_affine(patches, weight, scale, shift, alpha, *, act, tm=512):
    """(patches @ weight) * scale + shift (+ PReLU), via the Pallas kernel.

    patches [M, K] f32, weight [K, Cout] f32, scale/shift/alpha [Cout] f32.
    Returns [M, Cout] f32.
    """
    M, K = patches.shape
    Cout = weight.shape[1]

    K_pad = _round_up(K, 128)
    C_pad = _round_up(Cout, 128)
    tk = _pick_tk(K_pad)
    tm_eff = min(tm, _round_up(M, 16))
    M_pad = _round_up(M, tm_eff)

    x = jnp.pad(patches, ((0, M_pad - M), (0, K_pad - K))).astype(jnp.bfloat16)
    w = jnp.pad(weight, ((0, K_pad - K), (0, C_pad - Cout))).astype(jnp.bfloat16)
    s = jnp.pad(scale, (0, C_pad - Cout)).reshape(1, C_pad).astype(jnp.float32)
    b = jnp.pad(shift, (0, C_pad - Cout)).reshape(1, C_pad).astype(jnp.float32)
    a = jnp.pad(alpha, (0, C_pad - Cout)).reshape(1, C_pad).astype(jnp.float32)

    kernel = functools.partial(_conv_matmul_kernel, act=act)
    out = pl.pallas_call(
        kernel,
        out_shape=jax.ShapeDtypeStruct((M_pad, C_pad), jnp.float32),
        grid_spec=pltpu.PrefetchScalarGridSpec(
            num_scalar_prefetch=0,
            grid=(M_pad // tm_eff, K_pad // tk),
            in_specs=[
                pl.BlockSpec((tm_eff, tk), lambda m, k: (m, k)),
                pl.BlockSpec((tk, C_pad), lambda m, k: (k, 0)),
                pl.BlockSpec((1, C_pad), lambda m, k: (0, 0)),
                pl.BlockSpec((1, C_pad), lambda m, k: (0, 0)),
                pl.BlockSpec((1, C_pad), lambda m, k: (0, 0)),
            ],
            out_specs=pl.BlockSpec((tm_eff, C_pad), lambda m, k: (m, 0)),
        ),
        compiler_params=pltpu.CompilerParams(
            dimension_semantics=("parallel", "arbitrary")),
    )(x, w, s, b, a)
    return out[:M, :Cout]


# ------------------------------- JAX glue ----------------------------------- #
def _im2col(x_nhwc, ks, pad, stride):
    """x [N,H,W,C] -> patches [N*Ho*Wo, ks*ks*C], tap order (dy, dx, ci)."""
    N, H, W, C = x_nhwc.shape
    Ho = (H + 2 * pad - ks) // stride + 1
    Wo = (W + 2 * pad - ks) // stride + 1
    xp = jnp.pad(x_nhwc, ((0, 0), (pad, pad), (pad, pad), (0, 0)))
    cols = []
    for dy in range(ks):
        for dx in range(ks):
            cols.append(lax.slice(
                xp,
                (0, dy, dx, 0),
                (N, dy + stride * (Ho - 1) + 1, dx + stride * (Wo - 1) + 1, C),
                (1, stride, stride, 1)))
    patches = jnp.concatenate(cols, axis=-1)          # [N, Ho, Wo, ks*ks*C]
    return patches.reshape(N * Ho * Wo, ks * ks * C), (N, Ho, Wo)


def _ref_conv(x, w, *, stride=1):
    ph, pw = w.shape[0] // 2, w.shape[1] // 2
    return lax.conv_general_dilated(
        x, w, window_strides=(stride, stride),
        padding=[(ph, ph), (pw, pw)],
        dimension_numbers=("NHWC", "HWIO", "NHWC"))


def conv_bn_act(x_nhwc, w_hwio, scale, shift, alpha, *, stride=1, act="none",
                use_pallas=True):
    """Conv (no bias) + folded BN (+ optional PReLU)."""
    Cout = w_hwio.shape[-1]
    if not use_pallas:                                   # pure-JAX reference
        y = _ref_conv(x_nhwc, w_hwio, stride=stride) * scale + shift
        if act == "prelu":
            y = jnp.where(y >= 0.0, y, alpha * y)
        return y

    ks = w_hwio.shape[0]
    if ks == 1:                                          # 1x1: no im2col
        xs = x_nhwc[:, ::stride, ::stride, :]
        N, Ho, Wo, C = xs.shape
        patches = xs.reshape(N * Ho * Wo, C)
    else:
        patches, (N, Ho, Wo) = _im2col(x_nhwc, ks, ks // 2, stride)
    w_flat = w_hwio.reshape(-1, Cout)                    # (dy, dx, ci) order
    out = _matmul_affine(patches, w_flat, scale, shift, alpha, act=act)
    return out.reshape(N, Ho, Wo, Cout)


def _bn_fold(bn, eps=1e-5):
    scale = bn["gamma"] / jnp.sqrt(bn["var"] + eps)
    shift = bn["beta"] - bn["mean"] * scale
    return scale, shift


def _bn_apply(x_nhwc, bn):
    s, t = _bn_fold(bn)
    return x_nhwc * s + t


def _prelu(x, a):
    return jnp.where(x >= 0.0, x, a * x)


def _maxpool2x2(x):
    N, H, W, C = x.shape
    return x.reshape(N, H // 2, 2, W // 2, 2, C).max(axis=(2, 4))


def _se_block(x_nhwc, p):
    y = x_nhwc.mean(axis=(1, 2))                 # AdaptiveAvgPool2d(1) -> [N,C]
    y = y @ p["w1"] + p["b1"]
    y = _prelu(y, p["alpha"])
    y = y @ p["w2"] + p["b2"]
    y = jax.nn.sigmoid(y)
    return x_nhwc * y[:, None, None, :]


def ir_block(x, p, *, use_pallas, use_se=True):
    stride = p["stride"]
    planes = p["conv2"].shape[-1]
    residual = x

    out = _bn_apply(x, p["bn0"])
    s1, t1 = _bn_fold(p["bn1"])
    a1 = jnp.full((p["conv1"].shape[-1],), p["prelu"], jnp.float32)
    out = conv_bn_act(out, p["conv1"], s1, t1, a1, stride=1, act="prelu",
                      use_pallas=use_pallas)

    s2, t2 = _bn_fold(p["bn2"])
    out = conv_bn_act(out, p["conv2"], s2, t2,
                      jnp.zeros((planes,), jnp.float32),
                      stride=stride, act="none", use_pallas=use_pallas)

    if use_se:
        out = _se_block(out, p["se"])

    if "down_conv" in p:
        sd, td = _bn_fold(p["down_bn"])
        residual = conv_bn_act(x, p["down_conv"], sd, td,
                               jnp.zeros((planes,), jnp.float32),
                               stride=stride, act="none",
                               use_pallas=use_pallas)

    out = out + residual
    return _prelu(out, p["prelu"])


def resnet_face_forward(x_nchw, params, *, use_pallas=True, use_se=True):
    x = jnp.transpose(x_nchw, (0, 2, 3, 1))             # NCHW -> NHWC
    s1, t1 = _bn_fold(params["bn1"])
    a1 = jnp.full((params["conv1"].shape[-1],), params["prelu"], jnp.float32)
    x = conv_bn_act(x, params["conv1"], s1, t1, a1, stride=1, act="prelu",
                    use_pallas=use_pallas)
    x = _maxpool2x2(x)
    for layer in ("layer1", "layer2", "layer3", "layer4"):
        for blk in params[layer]:
            x = ir_block(x, blk, use_pallas=use_pallas, use_se=use_se)
    return jnp.transpose(x, (0, 3, 1, 2))               # NHWC -> NCHW


# ------------------------------ init helpers -------------------------------- #
def _xavier_conv(key, kh, kw, cin, cout):
    std = math.sqrt(2.0 / (kh * kw * cin + kh * kw * cout))
    return std * jax.random.normal(key, (kh, kw, cin, cout), jnp.float32)


def _xavier_linear(key, fin, fout):
    std = math.sqrt(2.0 / (fin + fout))
    return std * jax.random.normal(key, (fin, fout), jnp.float32)


def _bn_params(key, c):
    k1, k2, k3, k4 = jax.random.split(key, 4)
    return {
        "gamma": 1.0 + 0.1 * jax.random.normal(k1, (c,), jnp.float32),
        "beta": 0.1 * jax.random.normal(k2, (c,), jnp.float32),
        "mean": 0.1 * jax.random.normal(k3, (c,), jnp.float32),
        "var": 1.0 + 0.1 * jnp.abs(jax.random.normal(k4, (c,), jnp.float32)),
    }


def _ir_block_params(key, inplanes, planes, stride, use_se):
    keys = jax.random.split(key, 10)
    p = {
        "stride": stride,
        "bn0": _bn_params(keys[0], inplanes),
        "conv1": _xavier_conv(keys[1], 3, 3, inplanes, inplanes),
        "bn1": _bn_params(keys[2], inplanes),
        "conv2": _xavier_conv(keys[3], 3, 3, inplanes, planes),
        "bn2": _bn_params(keys[4], planes),
        "prelu": jnp.float32(0.25),
    }
    if use_se:
        hidden = max(planes // 16, 1)
        p["se"] = {
            "w1": _xavier_linear(keys[5], planes, hidden),
            "b1": jnp.zeros((hidden,), jnp.float32),
            "alpha": jnp.float32(0.25),
            "w2": _xavier_linear(keys[6], hidden, planes),
            "b2": jnp.zeros((planes,), jnp.float32),
        }
    if stride != 1 or inplanes != planes:
        p["down_conv"] = _xavier_conv(keys[7], 1, 1, inplanes, planes)
        p["down_bn"] = _bn_params(keys[8], planes)
    return p


def init_params(key, layers=(1, 1, 1, 1), use_se=True):
    keys = jax.random.split(key, 3 + sum(layers))
    params = {
        "conv1": _xavier_conv(keys[0], 3, 3, 3, 64),
        "bn1": _bn_params(keys[1], 64),
        "prelu": jnp.float32(0.25),
    }
    ki = 2
    inplanes = 64
    for li, (planes, nblocks, stride) in enumerate(
            zip((64, 128, 256, 512), layers, (1, 2, 2, 2)), start=1):
        blocks = []
        for b in range(nblocks):
            s = stride if b == 0 else 1
            blocks.append(_ir_block_params(keys[ki], inplanes, planes, s, use_se))
            inplanes = planes
            ki += 1
        params[f"layer{li}"] = blocks
    return params


# --------------------------------- main -------------------------------------- #
if __name__ == "__main__":
    N, C, H, W = 2, 3, 16, 16
    key = jax.random.PRNGKey(0)
    kp, kx = jax.random.split(key)
    params = init_params(kp, layers=(1, 1, 1, 1), use_se=True)
    x = jax.random.normal(kx, (N, C, H, W), jnp.float32)

    out = resnet_face_forward(x, params, use_pallas=True)
    jax.block_until_ready(out)

    ref = resnet_face_forward(x, params, use_pallas=False)
    jax.block_until_ready(ref)

    assert out.shape == (N, 512, H // 16, W // 16), out.shape
    rel = jnp.linalg.norm(out - ref) / (jnp.linalg.norm(ref) + 1e-6)
    assert float(rel) < 5e-2, f"relative L2 error too high: {float(rel)}"

    print("KERNEL_OK")
</pallas_src>

<mosaic_0001>
module attributes {stable_mosaic.version = 11 : i64} {
  func.func @_conv_matmul_kernel(%arg0: i32, %arg1: i32, %arg2: memref<512x128xbf16, #tpu.memory_space<vmem>>, %arg3: memref<128x128xbf16, #tpu.memory_space<vmem>>, %arg4: memref<1x128xf32, #tpu.memory_space<vmem>>, %arg5: memref<1x128xf32, #tpu.memory_space<vmem>>, %arg6: memref<1x128xf32, #tpu.memory_space<vmem>>, %arg7: memref<512x128xf32, #tpu.memory_space<vmem>>) attributes {dimension_semantics = [#tpu.dimension_semantics<parallel>, #tpu.dimension_semantics<arbitrary>], iteration_bounds = array<i64: 1, 1>, scalar_prefetch = 0 : i64, scratch_operands = 0 : i64, tpu.core_type = #tpu.core_type<tc>, window_params = [{transform_indices = @transform_0, window_bounds = array<i64: 512, 128>}, {transform_indices = @transform_1, window_bounds = array<i64: 128, 128>}, {pipeline_mode = #tpu.pipeline_mode<synchronous>, transform_indices = @transform_2, window_bounds = array<i64: 1, 128>}, {pipeline_mode = #tpu.pipeline_mode<synchronous>, transform_indices = @transform_3, window_bounds = array<i64: 1, 128>}, {pipeline_mode = #tpu.pipeline_mode<synchronous>, transform_indices = @transform_4, window_bounds = array<i64: 1, 128>}, {transform_indices = @transform_5, window_bounds = array<i64: 512, 128>}]} {
    %c0_i32 = arith.constant 0 : i32
    %0 = arith.cmpi eq, %arg1, %c0_i32 : i32
    %1 = arith.extui %0 : i1 to i32
    %c0_i32_0 = arith.constant 0 : i32
    %2 = arith.cmpi ne, %1, %c0_i32_0 : i32
    scf.if %2 {
      %cst_10 = arith.constant 0.000000e+00 : f32
      %12 = vector.broadcast %cst_10 : f32 to vector<512x128xf32>
      %c0_11 = arith.constant 0 : index
      %c0_12 = arith.constant 0 : index
      %13 = vector.load %arg7[%c0_11, %c0_12] : memref<512x128xf32, #tpu.memory_space<vmem>>, vector<512x128xf32>
      tpu.vector_store %arg7[%c0_11, %c0_12], %12 {strides = array<i32>} : memref<512x128xf32, #tpu.memory_space<vmem>>, vector<512x128xf32>,
    } else {
    }
    %c0 = arith.constant 0 : index
    %c0_1 = arith.constant 0 : index
    %3 = vector.load %arg7[%c0, %c0_1] : memref<512x128xf32, #tpu.memory_space<vmem>>, vector<512x128xf32>
    %c0_2 = arith.constant 0 : index
    %c0_3 = arith.constant 0 : index
    %4 = vector.load %arg2[%c0_2, %c0_3] : memref<512x128xbf16, #tpu.memory_space<vmem>>, vector<512x128xbf16>
    %c0_4 = arith.constant 0 : index
    %c0_5 = arith.constant 0 : index
    %5 = vector.load %arg3[%c0_4, %c0_5] : memref<128x128xbf16, #tpu.memory_space<vmem>>, vector<128x128xbf16>
    %cst = arith.constant dense<0.000000e+00> : vector<512x128xf32>
    %6 = tpu.matmul %4, %5, %cst {dimension_numbers = #tpu.dot_dimension_numbers<[1], [0], [0], [1], [0, 0, 1, 1], [], []>} : vector<512x128xbf16>, vector<128x128xbf16>, vector<512x128xf32> -> vector<512x128xf32>
    %7 = arith.addf %3, %6 : vector<512x128xf32>
    %c0_6 = arith.constant 0 : index
    %c0_7 = arith.constant 0 : index
    %8 = vector.load %arg7[%c0_6, %c0_7] : memref<512x128xf32, #tpu.memory_space<vmem>>, vector<512x128xf32>
    tpu.vector_store %arg7[%c0_6, %c0_7], %7 {strides = array<i32>} : memref<512x128xf32, #tpu.memory_space<vmem>>, vector<512x128xf32>,
    %c0_i32_8 = arith.constant 0 : i32
    %9 = arith.cmpi eq, %arg1, %c0_i32_8 : i32
    %10 = arith.extui %9 : i1 to i32
    %c0_i32_9 = arith.constant 0 : i32
    %11 = arith.cmpi ne, %10, %c0_i32_9 : i32
    scf.if %11 {
      %c0_10 = arith.constant 0 : index
      %c0_11 = arith.constant 0 : index
      %12 = vector.load %arg7[%c0_10, %c0_11] : memref<512x128xf32, #tpu.memory_space<vmem>>, vector<512x128xf32>
      %c0_12 = arith.constant 0 : index
      %c0_13 = arith.constant 0 : index
      %13 = vector.load %arg4[%c0_12, %c0_13] : memref<1x128xf32, #tpu.memory_space<vmem>>, vector<1x128xf32>
      %14 = vector.broadcast %13 : vector<1x128xf32> to vector<512x128xf32>
      %15 = arith.mulf %12, %14 : vector<512x128xf32>
      %c0_14 = arith.constant 0 : index
      %c0_15 = arith.constant 0 : index
      %16 = vector.load %arg5[%c0_14, %c0_15] : memref<1x128xf32, #tpu.memory_space<vmem>>, vector<1x128xf32>
      %17 = vector.broadcast %16 : vector<1x128xf32> to vector<512x128xf32>
      %18 = arith.addf %15, %17 : vector<512x128xf32>
      %cst_16 = arith.constant 0.000000e+00 : f32
      %19 = vector.broadcast %cst_16 : f32 to vector<512x128xf32>
      %20 = arith.cmpf oge, %18, %19 : vector<512x128xf32>
      %c0_17 = arith.constant 0 : index
      %c0_18 = arith.constant 0 : index
      %21 = vector.load %arg6[%c0_17, %c0_18] : memref<1x128xf32, #tpu.memory_space<vmem>>, vector<1x128xf32>
      %22 = vector.broadcast %21 : vector<1x128xf32> to vector<512x128xf32>
      %23 = arith.mulf %22, %18 : vector<512x128xf32>
      %24 = arith.select %20, %18, %23 : vector<512x128xi1>, vector<512x128xf32>
      %c0_19 = arith.constant 0 : index
      %c0_20 = arith.constant 0 : index
      %25 = vector.load %arg7[%c0_19, %c0_20] : memref<512x128xf32, #tpu.memory_space<vmem>>, vector<512x128xf32>
      tpu.vector_store %arg7[%c0_19, %c0_20], %24 {strides = array<i32>} : memref<512x128xf32, #tpu.memory_space<vmem>>, vector<512x128xf32>,
    } else {
    }
    return
  }
  func.func @transform_0(%arg0: i32, %arg1: i32) -> (i32, i32) {
    %c0_i32 = arith.constant 0 : i32
    return %arg0, %arg1 : i32, i32
  }
  func.func @transform_1(%arg0: i32, %arg1: i32) -> (i32, i32) {
    %c0_i32 = arith.constant 0 : i32
    %c0_i32_0 = arith.constant 0 : i32
    return %arg1, %c0_i32 : i32, i32
  }
  func.func @transform_2(%arg0: i32, %arg1: i32) -> (i32, i32) {
    %c0_i32 = arith.constant 0 : i32
    %c0_i32_0 = arith.constant 0 : i32
    %c0_i32_1 = arith.constant 0 : i32
    return %c0_i32, %c0_i32_0 : i32, i32
  }
  func.func @transform_3(%arg0: i32, %arg1: i32) -> (i32, i32) {
    %c0_i32 = arith.constant 0 : i32
    %c0_i32_0 = arith.constant 0 : i32
    %c0_i32_1 = arith.constant 0 : i32
    return %c0_i32, %c0_i32_0 : i32, i32
  }
  func.func @transform_4(%arg0: i32, %arg1: i32) -> (i32, i32) {
    %c0_i32 = arith.constant 0 : i32
    %c0_i32_0 = arith.constant 0 : i32
    %c0_i32_1 = arith.constant 0 : i32
    return %c0_i32, %c0_i32_0 : i32, i32
  }
  func.func @transform_5(%arg0: i32, %arg1: i32) -> (i32, i32) {
    %c0_i32 = arith.constant 0 : i32
    %c0_i32_0 = arith.constant 0 : i32
    return %arg0, %c0_i32 : i32, i32
  }
}

</mosaic_0001>

<bundles_post_ra>
// kernel: tpu_custom_call.1
= control target key start
LH: loop header
LB: loop body
LE: loop exit
PB: predicated region body
PF: predicated region fallthrough
CT: control target
= control target key end

     0   :  { %10 = vsyncpa [#allocation3], 0  ;;  %s1851_s0 = inlined_call_operand.hbm [shape: bf16[512,128], index: 0, kind: input, shape index: {}]   ;;  %s1852_s1 = inlined_call_operand.hbm [shape: bf16[128,128], index: 1, kind: input, shape index: {}]   ;;  %s1853_s2 = inlined_call_operand.vmem [shape: f32[1,128], index: 2, kind: input, shape index: {}]   ;;  %s1854_s3 = inlined_call_operand.vmem [shape: f32[1,128], index: 3, kind: input, shape index: {}]   ;;  %s1855_s4 = inlined_call_operand.vmem [shape: f32[1,128], index: 4, kind: input, shape index: {}]   ;;  %s1856_s5 = inlined_call_operand.hbm [shape: f32[512,128], index: 5, kind: output, shape index: {}]  }
   0x1   :  { %11 = vsyncpa [#allocation6], 0 }
   0x2   :  { %12 = vsyncpa [#allocation4], 0  ;;  %s17_s20 = sshll.u32 %s1851_s0, 4  ;;  %s1598_s21 = smov [#allocation2]   ;;  %s18_s20 = int_to_ptr.hbm [resolvable:$true] %s17_s20 }
   0x3   :  { %s19_s22 = sshll.u32 %s1598_s21, 4  ;;  %s30_s25 = sshll.u32 %s1852_s1, 4  ;;  %s20_s22 = int_to_ptr.vmem [resolvable:$true] %s19_s22  ;;  %s31_s25 = int_to_ptr.hbm [resolvable:$true] %s30_s25 }
   0x4   :  { %s1599_s26 = smov 64   ;;  %s1600_s27 = smov 4  }
   0x5   :  { %25 = dma.hbm_to_vmem [thread:$0]  %s18_s20, 4096, %s20_s22, [#allocation3], %s1599_s26, %s1599_s26, %s1600_s27  }
   0x6   :  { %s1601_s28 = smov [#allocation5]  }
   0x7   :  { %s32_s29 = sshll.u32 %s1601_s28, 4  ;;  %s33_s29 = int_to_ptr.vmem [resolvable:$true] %s32_s29 }
   0x8   :  { %38 = dma.hbm_to_vmem [thread:$0]  %s31_s25, 1024, %s33_s29, [#allocation6], %s1599_s26, %s1599_s26, %s1600_s27  }
   0x9   :  { %1592 = dma.done.wait [#allocation3], 4096  }
   0xa   :  { %1593 = vsyncadd [#allocation3], 4294963200 }
   0xb   :  { %1594 = dma.done.wait [#allocation6], 1024  }
   0xc   :  { %1595 = vsyncadd [#allocation6], 4294966272  ;;  %v1484_v0 = vld [vmem:[#allocation5 + $0x38] sm:$0xff]  ;;  %v1483_v1 = vld [vmem:[#allocation5 + $0x30] sm:$0xff]  ;;  %s1271_s10 = sshll.u32 %s1856_s5, 4  ;;  %s1603_s11 = smov 128   ;;  %s1272_s10 = int_to_ptr.hbm [resolvable:$true] %s1271_s10 }
   0xd   :  { %505 = vmatpush.bf16.msra.mxu0 %v1484_v0  ;;  %1485 = vmatpush.bf16.msra.mxu1 %v1484_v0  ;;  %v1482_v2 = vld [vmem:[#allocation5 + $0x28] sm:$0xff]  ;;  %v1481_v3 = vld [vmem:[#allocation5 + $0x20] sm:$0xff]  ;;  %v1480_v4 = vld [vmem:[#allocation5 + $0x18] sm:$0xff]  ;;  %s1604_s12 = smov 8  }
   0xe   :  { %1486 = vmatpush.bf16.msra.mxu2 %v1484_v0  ;;  %1487 = vmatpush.bf16.msra.mxu3 %v1484_v0  ;;  %v1479_v5 = vld [vmem:[#allocation5 + $0x10] sm:$0xff]  ;;  %v1478_v6 = vld [vmem:[#allocation5 + $0x8] sm:$0xff]  ;;  %v1477_v7 = vld [vmem:[#allocation5] sm:$0xff] }
   0xf   :  { %v1445_v8 = vld [vmem:[#allocation2] sm:$0xff]  ;;  %v1446_v12 = vld [vmem:[#allocation2 + $0x8] sm:$0xff]  ;;  %v1447_v16 = vld [vmem:[#allocation2 + $0x10] sm:$0xff] }
  0x10   :  { %v1453_v9 = vld [vmem:[#allocation2 + $0x40] sm:$0xff]  ;;  %v1454_v13 = vld [vmem:[#allocation2 + $0x48] sm:$0xff]  ;;  %v1455_v17 = vld [vmem:[#allocation2 + $0x50] sm:$0xff] }
  0x11   :  { %506 = vmatpush.bf16.msra.mxu0 %v1483_v1  ;;  %1488 = vmatpush.bf16.msra.mxu1 %v1483_v1  ;;  %v1461_v10 = vld [vmem:[#allocation2 + $0x80] sm:$0xff]  ;;  %v1462_v14 = vld [vmem:[#allocation2 + $0x88] sm:$0xff]  ;;  %v1463_v18 = vld [vmem:[#allocation2 + $0x90] sm:$0xff] }
  0x12   :  { %1489 = vmatpush.bf16.msra.mxu2 %v1483_v1  ;;  %1490 = vmatpush.bf16.msra.mxu3 %v1483_v1  ;;  %v1469_v11 = vld [vmem:[#allocation2 + $0xc0] sm:$0xff]  ;;  %v1470_v15 = vld [vmem:[#allocation2 + $0xc8] sm:$0xff]  ;;  %v1471_v19 = vld [vmem:[#allocation2 + $0xd0] sm:$0xff] }
  0x13   :  { %v1448_v20 = vld [vmem:[#allocation2 + $0x18] sm:$0xff]  ;;  %v1449_v24 = vld [vmem:[#allocation2 + $0x20] sm:$0xff]  ;;  %v1450_v28 = vld [vmem:[#allocation2 + $0x28] sm:$0xff] }
  0x14   :  { %v1456_v21 = vld [vmem:[#allocation2 + $0x58] sm:$0xff]  ;;  %v1457_v25 = vld [vmem:[#allocation2 + $0x60] sm:$0xff]  ;;  %v1458_v29 = vld [vmem:[#allocation2 + $0x68] sm:$0xff] }
  0x15   :  { %507 = vmatpush.bf16.msra.mxu0 %v1482_v2  ;;  %1491 = vmatpush.bf16.msra.mxu1 %v1482_v2  ;;  %v1464_v22 = vld [vmem:[#allocation2 + $0x98] sm:$0xff]  ;;  %v1465_v26 = vld [vmem:[#allocation2 + $0xa0] sm:$0xff]  ;;  %v1466_v30 = vld [vmem:[#allocation2 + $0xa8] sm:$0xff] }
  0x16   :  { %1492 = vmatpush.bf16.msra.mxu2 %v1482_v2  ;;  %1493 = vmatpush.bf16.msra.mxu3 %v1482_v2  ;;  %v1472_v23 = vld [vmem:[#allocation2 + $0xd8] sm:$0xff]  ;;  %v1473_v27 = vld [vmem:[#allocation2 + $0xe0] sm:$0xff]  ;;  %v1474_v31 = vld [vmem:[#allocation2 + $0xe8] sm:$0xff] }
  0x17   :  { %v1451_v32 = vld [vmem:[#allocation2 + $0x30] sm:$0xff]  ;;  %v1452_v36 = vld [vmem:[#allocation2 + $0x38] sm:$0xff]  ;;  %v1644_v40 = vld [vmem:[%s1853_s2] ss:$0 sm:$0xff]  ;;  %s1602_s2 = smov [#allocation7]  }
  0x18   :  { %v1459_v33 = vld [vmem:[#allocation2 + $0x70] sm:$0xff]  ;;  %v1460_v37 = vld [vmem:[#allocation2 + $0x78] sm:$0xff]  ;;  %v1649_v43 = vld [vmem:[%s1854_s3] ss:$0 sm:$0xff]  ;;  %s1269_s3 = sshll.u32 %s1602_s2, 4  ;;  %s1270_s3 = int_to_ptr.vmem [resolvable:$true] %s1269_s3 }
  0x19   :  { %508 = vmatpush.bf16.msra.mxu0 %v1481_v3  ;;  %1494 = vmatpush.bf16.msra.mxu1 %v1481_v3  ;;  %v1467_v34 = vld [vmem:[#allocation2 + $0xb0] sm:$0xff]  ;;  %v1468_v38 = vld [vmem:[#allocation2 + $0xb8] sm:$0xff]  ;;  %v1655_v45 = vld [vmem:[%s1855_s4] ss:$0 sm:$0xff] }
  0x1a   :  { %1495 = vmatpush.bf16.msra.mxu2 %v1481_v3  ;;  %1496 = vmatpush.bf16.msra.mxu3 %v1481_v3  ;;  %v1475_v35 = vld [vmem:[#allocation2 + $0xf0] sm:$0xff]  ;;  %v1476_v39 = vld [vmem:[#allocation2 + $0xf8] sm:$0xff] }
  0x1d   :  { %509 = vmatpush.bf16.msra.mxu0 %v1480_v4  ;;  %1497 = vmatpush.bf16.msra.mxu1 %v1480_v4 }
  0x1e   :  { %1498 = vmatpush.bf16.msra.mxu2 %v1480_v4  ;;  %1499 = vmatpush.bf16.msra.mxu3 %v1480_v4 }
  0x21   :  { %510 = vmatpush.bf16.msra.mxu0 %v1479_v5  ;;  %1500 = vmatpush.bf16.msra.mxu1 %v1479_v5 }
  0x22   :  { %1501 = vmatpush.bf16.msra.mxu2 %v1479_v5  ;;  %1502 = vmatpush.bf16.msra.mxu3 %v1479_v5 }
  0x25   :  { %511 = vmatpush.bf16.msra.mxu0 %v1478_v6  ;;  %1503 = vmatpush.bf16.msra.mxu1 %v1478_v6 }
  0x26   :  { %1504 = vmatpush.bf16.msra.mxu2 %v1478_v6  ;;  %1505 = vmatpush.bf16.msra.mxu3 %v1478_v6 }
  0x29   :  { %512 = vmatpush.bf16.msra.mxu0 %v1477_v7  ;;  %1506 = vmatpush.bf16.msra.mxu1 %v1477_v7 }
  0x2a   :  { %1507 = vmatpush.bf16.msra.mxu2 %v1477_v7  ;;  %1508 = vmatpush.bf16.msra.mxu3 %v1477_v7 }
  0x2c   :  { %513 = vmatmul.bf16.vlgmr.msra.gmra.mxu0 %v1445_v8  ;;  %553 = vmatmul.bf16.vlgmr.msra.gmra.mxu1 %v1453_v9 }
  0x2d   :  { %593 = vmatmul.bf16.vlgmr.msra.gmra.mxu2 %v1461_v10  ;;  %633 = vmatmul.bf16.vlgmr.msra.gmra.mxu3 %v1469_v11 }
  0x3c   :  { %518 = vmatmul.bf16.gmra.mxu0 %v1446_v12  ;;  %558 = vmatmul.bf16.gmra.mxu1 %v1454_v13 }
  0x3d   :  { %598 = vmatmul.bf16.gmra.mxu2 %v1462_v14  ;;  %638 = vmatmul.bf16.gmra.mxu3 %v1470_v15 }
  0x4c   :  { %523 = vmatmul.bf16.gmra.mxu0 %v1447_v16  ;;  %563 = vmatmul.bf16.gmra.mxu1 %v1455_v17 }
  0x4d   :  { %603 = vmatmul.bf16.gmra.mxu2 %v1463_v18  ;;  %643 = vmatmul.bf16.gmra.mxu3 %v1471_v19 }
  0x5c   :  { %528 = vmatmul.bf16.gmra.mxu0 %v1448_v20  ;;  %568 = vmatmul.bf16.gmra.mxu1 %v1456_v21 }
  0x5d   :  { %608 = vmatmul.bf16.gmra.mxu2 %v1464_v22  ;;  %648 = vmatmul.bf16.gmra.mxu3 %v1472_v23 }
  0x6c   :  { %533 = vmatmul.bf16.gmra.mxu0 %v1449_v24  ;;  %573 = vmatmul.bf16.gmra.mxu1 %v1457_v25 }
  0x6d   :  { %613 = vmatmul.bf16.gmra.mxu2 %v1465_v26  ;;  %653 = vmatmul.bf16.gmra.mxu3 %v1473_v27 }
  0x7c   :  { %538 = vmatmul.bf16.gmra.mxu0 %v1450_v28  ;;  %578 = vmatmul.bf16.gmra.mxu1 %v1458_v29 }
  0x7d   :  { %618 = vmatmul.bf16.gmra.mxu2 %v1466_v30  ;;  %658 = vmatmul.bf16.gmra.mxu3 %v1474_v31 }
  0x8c   :  { %543 = vmatmul.bf16.gmra.mxu0 %v1451_v32  ;;  %583 = vmatmul.bf16.gmra.mxu1 %v1459_v33 }
  0x8d   :  { %623 = vmatmul.bf16.gmra.mxu2 %v1467_v34  ;;  %663 = vmatmul.bf16.gmra.mxu3 %v1475_v35 }
  0x9c   :  { %548 = vmatmul.bf16.gmra.mxu0 %v1452_v36  ;;  %588 = vmatmul.bf16.gmra.mxu1 %v1460_v37 }
  0x9d   :  { %628 = vmatmul.bf16.gmra.mxu2 %v1468_v38  ;;  %668 = vmatmul.bf16.gmra.mxu3 %v1476_v39 }
  0xa9   :  { %v514_v41 = vpop.f32.mrf.mxu0  ;;  %v554_v42 = vpop.f32.mrf.mxu1 }
  0xaa   :  { %v873_v44 = vmul.f32 %v1644_v40, %v514_v41  ;;  %v889_v46 = vmul.f32 %v1644_v40, %v554_v42 }
  0xac   :  { %v941_v47 = vadd.f32 %v1649_v43, %v873_v44  ;;  %v957_v48 = vadd.f32 %v1649_v43, %v889_v46 }
  0xae   :  { %vm1005_vm0 = vcmp.ge.f32.partialorder %v941_v47, 0.0  ;;  %v1073_v49 = vmul.f32 %v1655_v45, %v941_v47  ;;  %vm1021_vm1 = vcmp.ge.f32.partialorder %v957_v48, 0.0  ;;  %v1089_v50 = vmul.f32 %v1655_v45, %v957_v48 }
  0xb0   :  { %v594_v51 = vpop.f32.mrf.mxu2  ;;  %v634_v52 = vpop.f32.mrf.mxu3  ;;  %v1137_v55 = vsel %vm1005_vm0, %v941_v47, %v1073_v49  ;;  %v1153_v56 = vsel %vm1021_vm1, %v957_v48, %v1089_v50 }
  0xb1   :  { %v516_v53 = vpop.f32.mrf.mxu0  ;;  %v556_v54 = vpop.f32.mrf.mxu1  ;;  %1201 = vst [vmem:[#allocation7] sm:$0xff] %v1137_v55  ;;  %v905_v57 = vmul.f32 %v1644_v40, %v594_v51  ;;  %v921_v58 = vmul.f32 %v1644_v40, %v634_v52 }
  0xb2   :  { %1217 = vst [vmem:[#allocation7 + $0x80] sm:$0xff] %v1153_v56  ;;  %v874_v59 = vmul.f32 %v1644_v40, %v516_v53  ;;  %v890_v60 = vmul.f32 %v1644_v40, %v556_v54 }
  0xb3   :  { %v973_v61 = vadd.f32 %v1649_v43, %v905_v57  ;;  %v989_v62 = vadd.f32 %v1649_v43, %v921_v58 }
  0xb4   :  { %v942_v63 = vadd.f32 %v1649_v43, %v874_v59  ;;  %v958_v0 = vadd.f32 %v1649_v43, %v890_v60 }
  0xb5   :  { %vm1037_vm2 = vcmp.ge.f32.partialorder %v973_v61, 0.0  ;;  %v1105_v1 = vmul.f32 %v1655_v45, %v973_v61  ;;  %vm1053_vm3 = vcmp.ge.f32.partialorder %v989_v62, 0.0  ;;  %v1121_v2 = vmul.f32 %v1655_v45, %v989_v62 }
  0xb6   :  { %vm1006_vm4 = vcmp.ge.f32.partialorder %v942_v63, 0.0  ;;  %v1074_v3 = vmul.f32 %v1655_v45, %v942_v63  ;;  %vm1022_vm5 = vcmp.ge.f32.partialorder %v958_v0, 0.0  ;;  %v1090_v4 = vmul.f32 %v1655_v45, %v958_v0 }
  0xb7   :  { %v1169_v7 = vsel %vm1037_vm2, %v973_v61, %v1105_v1  ;;  %v1185_v8 = vsel %vm1053_vm3, %v989_v62, %v1121_v2 }
  0xb8   :  { %v596_v5 = vpop.f32.mrf.mxu2  ;;  %v636_v6 = vpop.f32.mrf.mxu3  ;;  %1233 = vst [vmem:[#allocation7 + $0x100] sm:$0xff] %v1169_v7  ;;  %v1138_v11 = vsel %vm1006_vm4, %v942_v63, %v1074_v3  ;;  %v1154_v12 = vsel %vm1022_vm5, %v958_v0, %v1090_v4 }
  0xb9   :  { %v519_v9 = vpop.f32.mrf.mxu0  ;;  %v559_v10 = vpop.f32.mrf.mxu1  ;;  %1249 = vst [vmem:[#allocation7 + $0x180] sm:$0xff] %v1185_v8  ;;  %v906_v13 = vmul.f32 %v1644_v40, %v596_v5  ;;  %v922_v14 = vmul.f32 %v1644_v40, %v636_v6 }
  0xba   :  { %1202 = vst [vmem:[#allocation7 + $0x8] sm:$0xff] %v1138_v11  ;;  %v875_v15 = vmul.f32 %v1644_v40, %v519_v9  ;;  %v891_v16 = vmul.f32 %v1644_v40, %v559_v10 }
  0xbb   :  { %1218 = vst [vmem:[#allocation7 + $0x88] sm:$0xff] %v1154_v12  ;;  %v974_v17 = vadd.f32 %v1649_v43, %v906_v13  ;;  %v990_v18 = vadd.f32 %v1649_v43, %v922_v14 }
  0xbc   :  { %v943_v19 = vadd.f32 %v1649_v43, %v875_v15  ;;  %v959_v20 = vadd.f32 %v1649_v43, %v891_v16 }
  0xbd   :  { %vm1038_vm6 = vcmp.ge.f32.partialorder %v974_v17, 0.0  ;;  %v1106_v21 = vmul.f32 %v1655_v45, %v974_v17  ;;  %vm1054_vm7 = vcmp.ge.f32.partialorder %v990_v18, 0.0  ;;  %v1122_v22 = vmul.f32 %v1655_v45, %v990_v18 }
  0xbe   :  { %vm1007_vm8 = vcmp.ge.f32.partialorder %v943_v19, 0.0  ;;  %v1075_v23 = vmul.f32 %v1655_v45, %v943_v19  ;;  %vm1023_vm9 = vcmp.ge.f32.partialorder %v959_v20, 0.0  ;;  %v1091_v24 = vmul.f32 %v1655_v45, %v959_v20 }
  0xbf   :  { %v1170_v27 = vsel %vm1038_vm6, %v974_v17, %v1106_v21  ;;  %v1186_v28 = vsel %vm1054_vm7, %v990_v18, %v1122_v22 }
  0xc0   :  { %v599_v25 = vpop.f32.mrf.mxu2  ;;  %v639_v26 = vpop.f32.mrf.mxu3  ;;  %1234 = vst [vmem:[#allocation7 + $0x108] sm:$0xff] %v1170_v27  ;;  %v1139_v31 = vsel %vm1007_vm8, %v943_v19, %v1075_v23  ;;  %v1155_v32 = vsel %vm1023_vm9, %v959_v20, %v1091_v24 }
  0xc1   :  { %v521_v29 = vpop.f32.mrf.mxu0  ;;  %v561_v30 = vpop.f32.mrf.mxu1  ;;  %1250 = vst [vmem:[#allocation7 + $0x188] sm:$0xff] %v1186_v28  ;;  %v907_v33 = vmul.f32 %v1644_v40, %v599_v25  ;;  %v923_v34 = vmul.f32 %v1644_v40, %v639_v26 }
  0xc2   :  { %1203 = vst [vmem:[#allocation7 + $0x10] sm:$0xff] %v1139_v31  ;;  %v876_v35 = vmul.f32 %v1644_v40, %v521_v29  ;;  %v892_v36 = vmul.f32 %v1644_v40, %v561_v30 }
  0xc3   :  { %1219 = vst [vmem:[#allocation7 + $0x90] sm:$0xff] %v1155_v32  ;;  %v975_v37 = vadd.f32 %v1649_v43, %v907_v33  ;;  %v991_v38 = vadd.f32 %v1649_v43, %v923_v34 }
  0xc4   :  { %v944_v39 = vadd.f32 %v1649_v43, %v876_v35  ;;  %v960_v41 = vadd.f32 %v1649_v43, %v892_v36 }
  0xc5   :  { %vm1039_vm10 = vcmp.ge.f32.partialorder %v975_v37, 0.0  ;;  %v1107_v42 = vmul.f32 %v1655_v45, %v975_v37  ;;  %vm1055_vm11 = vcmp.ge.f32.partialorder %v991_v38, 0.0  ;;  %v1123_v44 = vmul.f32 %v1655_v45, %v991_v38 }
  0xc6   :  { %vm1008_vm12 = vcmp.ge.f32.partialorder %v944_v39, 0.0  ;;  %v1076_v46 = vmul.f32 %v1655_v45, %v944_v39  ;;  %vm1024_vm13 = vcmp.ge.f32.partialorder %v960_v41, 0.0  ;;  %v1092_v47 = vmul.f32 %v1655_v45, %v960_v41 }
  0xc7   :  { %v1171_v50 = vsel %vm1039_vm10, %v975_v37, %v1107_v42  ;;  %v1187_v51 = vsel %vm1055_vm11, %v991_v38, %v1123_v44 }
  0xc8   :  { %v601_v48 = vpop.f32.mrf.mxu2  ;;  %v641_v49 = vpop.f32.mrf.mxu3  ;;  %1235 = vst [vmem:[#allocation7 + $0x110] sm:$0xff] %v1171_v50  ;;  %v1140_v54 = vsel %vm1008_vm12, %v944_v39, %v1076_v46  ;;  %v1156_v55 = vsel %vm1024_vm13, %v960_v41, %v1092_v47 }
  0xc9   :  { %v524_v52 = vpop.f32.mrf.mxu0  ;;  %v564_v53 = vpop.f32.mrf.mxu1  ;;  %1251 = vst [vmem:[#allocation7 + $0x190] sm:$0xff] %v1187_v51  ;;  %v908_v56 = vmul.f32 %v1644_v40, %v601_v48  ;;  %v924_v57 = vmul.f32 %v1644_v40, %v641_v49 }
  0xca   :  { %1204 = vst [vmem:[#allocation7 + $0x18] sm:$0xff] %v1140_v54  ;;  %v877_v58 = vmul.f32 %v1644_v40, %v524_v52  ;;  %v893_v59 = vmul.f32 %v1644_v40, %v564_v53 }
  0xcb   :  { %1220 = vst [vmem:[#allocation7 + $0x98] sm:$0xff] %v1156_v55  ;;  %v976_v60 = vadd.f32 %v1649_v43, %v908_v56  ;;  %v992_v61 = vadd.f32 %v1649_v43, %v924_v57 }
  0xcc   :  { %v945_v62 = vadd.f32 %v1649_v43, %v877_v58  ;;  %v961_v63 = vadd.f32 %v1649_v43, %v893_v59 }
  0xcd   :  { %vm1040_vm14 = vcmp.ge.f32.partialorder %v976_v60, 0.0  ;;  %v1108_v0 = vmul.f32 %v1655_v45, %v976_v60  ;;  %vm1056_vm15 = vcmp.ge.f32.partialorder %v992_v61, 0.0  ;;  %v1124_v1 = vmul.f32 %v1655_v45, %v992_v61 }
  0xce   :  { %vm1009_vm0 = vcmp.ge.f32.partialorder %v945_v62, 0.0  ;;  %v1077_v2 = vmul.f32 %v1655_v45, %v945_v62  ;;  %vm1025_vm1 = vcmp.ge.f32.partialorder %v961_v63, 0.0  ;;  %v1093_v3 = vmul.f32 %v1655_v45, %v961_v63 }
  0xcf   :  { %v1172_v6 = vsel %vm1040_vm14, %v976_v60, %v1108_v0  ;;  %v1188_v7 = vsel %vm1056_vm15, %v992_v61, %v1124_v1 }
  0xd0   :  { %v604_v4 = vpop.f32.mrf.mxu2  ;;  %v644_v5 = vpop.f32.mrf.mxu3  ;;  %1236 = vst [vmem:[#allocation7 + $0x118] sm:$0xff] %v1172_v6  ;;  %v1141_v10 = vsel %vm1009_vm0, %v945_v62, %v1077_v2  ;;  %v1157_v11 = vsel %vm1025_vm1, %v961_v63, %v1093_v3 }
  0xd1   :  { %v526_v8 = vpop.f32.mrf.mxu0  ;;  %v566_v9 = vpop.f32.mrf.mxu1  ;;  %1252 = vst [vmem:[#allocation7 + $0x198] sm:$0xff] %v1188_v7  ;;  %v909_v12 = vmul.f32 %v1644_v40, %v604_v4  ;;  %v925_v13 = vmul.f32 %v1644_v40, %v644_v5 }
  0xd2   :  { %1205 = vst [vmem:[#allocation7 + $0x20] sm:$0xff] %v1141_v10  ;;  %v878_v14 = vmul.f32 %v1644_v40, %v526_v8  ;;  %v894_v15 = vmul.f32 %v1644_v40, %v566_v9 }
  0xd3   :  { %1221 = vst [vmem:[#allocation7 + $0xa0] sm:$0xff] %v1157_v11  ;;  %v977_v16 = vadd.f32 %v1649_v43, %v909_v12  ;;  %v993_v17 = vadd.f32 %v1649_v43, %v925_v13 }
  0xd4   :  { %v946_v18 = vadd.f32 %v1649_v43, %v878_v14  ;;  %v962_v19 = vadd.f32 %v1649_v43, %v894_v15 }
  0xd5   :  { %vm1041_vm2 = vcmp.ge.f32.partialorder %v977_v16, 0.0  ;;  %v1109_v20 = vmul.f32 %v1655_v45, %v977_v16  ;;  %vm1057_vm3 = vcmp.ge.f32.partialorder %v993_v17, 0.0  ;;  %v1125_v21 = vmul.f32 %v1655_v45, %v993_v17 }
  0xd6   :  { %vm1010_vm4 = vcmp.ge.f32.partialorder %v946_v18, 0.0  ;;  %v1078_v22 = vmul.f32 %v1655_v45, %v946_v18  ;;  %vm1026_vm5 = vcmp.ge.f32.partialorder %v962_v19, 0.0  ;;  %v1094_v23 = vmul.f32 %v1655_v45, %v962_v19 }
  0xd7   :  { %v1173_v26 = vsel %vm1041_vm2, %v977_v16, %v1109_v20  ;;  %v1189_v27 = vsel %vm1057_vm3, %v993_v17, %v1125_v21 }
  0xd8   :  { %v606_v24 = vpop.f32.mrf.mxu2  ;;  %v646_v25 = vpop.f32.mrf.mxu3  ;;  %1237 = vst [vmem:[#allocation7 + $0x120] sm:$0xff] %v1173_v26  ;;  %v1142_v30 = vsel %vm1010_vm4, %v946_v18, %v1078_v22  ;;  %v1158_v31 = vsel %vm1026_vm5, %v962_v19, %v1094_v23 }
  0xd9   :  { %v529_v28 = vpop.f32.mrf.mxu0  ;;  %v569_v29 = vpop.f32.mrf.mxu1  ;;  %1253 = vst [vmem:[#allocation7 + $0x1a0] sm:$0xff] %v1189_v27  ;;  %v910_v32 = vmul.f32 %v1644_v40, %v606_v24  ;;  %v926_v33 = vmul.f32 %v1644_v40, %v646_v25 }
  0xda   :  { %1206 = vst [vmem:[#allocation7 + $0x28] sm:$0xff] %v1142_v30  ;;  %v879_v34 = vmul.f32 %v1644_v40, %v529_v28  ;;  %v895_v35 = vmul.f32 %v1644_v40, %v569_v29 }
  0xdb   :  { %1222 = vst [vmem:[#allocation7 + $0xa8] sm:$0xff] %v1158_v31  ;;  %v978_v36 = vadd.f32 %v1649_v43, %v910_v32  ;;  %v994_v37 = vadd.f32 %v1649_v43, %v926_v33 }
  0xdc   :  { %v947_v38 = vadd.f32 %v1649_v43, %v879_v34  ;;  %v963_v39 = vadd.f32 %v1649_v43, %v895_v35 }
  0xdd   :  { %vm1042_vm6 = vcmp.ge.f32.partialorder %v978_v36, 0.0  ;;  %v1110_v41 = vmul.f32 %v1655_v45, %v978_v36  ;;  %vm1058_vm7 = vcmp.ge.f32.partialorder %v994_v37, 0.0  ;;  %v1126_v42 = vmul.f32 %v1655_v45, %v994_v37 }
  0xde   :  { %vm1011_vm8 = vcmp.ge.f32.partialorder %v947_v38, 0.0  ;;  %v1079_v44 = vmul.f32 %v1655_v45, %v947_v38  ;;  %vm1027_vm9 = vcmp.ge.f32.partialorder %v963_v39, 0.0  ;;  %v1095_v46 = vmul.f32 %v1655_v45, %v963_v39 }
  0xdf   :  { %v1174_v49 = vsel %vm1042_vm6, %v978_v36, %v1110_v41  ;;  %v1190_v50 = vsel %vm1058_vm7, %v994_v37, %v1126_v42 }
  0xe0   :  { %v609_v47 = vpop.f32.mrf.mxu2  ;;  %v649_v48 = vpop.f32.mrf.mxu3  ;;  %1238 = vst [vmem:[#allocation7 + $0x128] sm:$0xff] %v1174_v49  ;;  %v1143_v53 = vsel %vm1011_vm8, %v947_v38, %v1079_v44  ;;  %v1159_v54 = vsel %vm1027_vm9, %v963_v39, %v1095_v46 }
  0xe1   :  { %v531_v51 = vpop.f32.mrf.mxu0  ;;  %v571_v52 = vpop.f32.mrf.mxu1  ;;  %1254 = vst [vmem:[#allocation7 + $0x1a8] sm:$0xff] %v1190_v50  ;;  %v911_v55 = vmul.f32 %v1644_v40, %v609_v47  ;;  %v927_v56 = vmul.f32 %v1644_v40, %v649_v48 }
  0xe2   :  { %1207 = vst [vmem:[#allocation7 + $0x30] sm:$0xff] %v1143_v53  ;;  %v880_v57 = vmul.f32 %v1644_v40, %v531_v51  ;;  %v896_v58 = vmul.f32 %v1644_v40, %v571_v52 }
  0xe3   :  { %1223 = vst [vmem:[#allocation7 + $0xb0] sm:$0xff] %v1159_v54  ;;  %v979_v59 = vadd.f32 %v1649_v43, %v911_v55  ;;  %v995_v60 = vadd.f32 %v1649_v43, %v927_v56 }
  0xe4   :  { %v948_v61 = vadd.f32 %v1649_v43, %v880_v57  ;;  %v964_v62 = vadd.f32 %v1649_v43, %v896_v58 }
  0xe5   :  { %vm1043_vm10 = vcmp.ge.f32.partialorder %v979_v59, 0.0  ;;  %v1111_v63 = vmul.f32 %v1655_v45, %v979_v59  ;;  %vm1059_vm11 = vcmp.ge.f32.partialorder %v995_v60, 0.0  ;;  %v1127_v0 = vmul.f32 %v1655_v45, %v995_v60 }
  0xe6   :  { %vm1012_vm12 = vcmp.ge.f32.partialorder %v948_v61, 0.0  ;;  %v1080_v1 = vmul.f32 %v1655_v45, %v948_v61  ;;  %vm1028_vm13 = vcmp.ge.f32.partialorder %v964_v62, 0.0  ;;  %v1096_v2 = vmul.f32 %v1655_v45, %v964_v62 }
  0xe7   :  { %v1175_v5 = vsel %vm1043_vm10, %v979_v59, %v1111_v63  ;;  %v1191_v6 = vsel %vm1059_vm11, %v995_v60, %v1127_v0 }
  0xe8   :  { %v611_v3 = vpop.f32.mrf.mxu2  ;;  %v651_v4 = vpop.f32.mrf.mxu3  ;;  %1239 = vst [vmem:[#allocation7 + $0x130] sm:$0xff] %v1175_v5  ;;  %v1144_v9 = vsel %vm1012_vm12, %v948_v61, %v1080_v1  ;;  %v1160_v10 = vsel %vm1028_vm13, %v964_v62, %v1096_v2 }
  0xe9   :  { %v534_v7 = vpop.f32.mrf.mxu0  ;;  %v574_v8 = vpop.f32.mrf.mxu1  ;;  %1255 = vst [vmem:[#allocation7 + $0x1b0] sm:$0xff] %v1191_v6  ;;  %v912_v11 = vmul.f32 %v1644_v40, %v611_v3  ;;  %v928_v12 = vmul.f32 %v1644_v40, %v651_v4 }
  0xea   :  { %1208 = vst [vmem:[#allocation7 + $0x38] sm:$0xff] %v1144_v9  ;;  %v881_v13 = vmul.f32 %v1644_v40, %v534_v7  ;;  %v897_v14 = vmul.f32 %v1644_v40, %v574_v8 }
  0xeb   :  { %1224 = vst [vmem:[#allocation7 + $0xb8] sm:$0xff] %v1160_v10  ;;  %v980_v15 = vadd.f32 %v1649_v43, %v912_v11  ;;  %v996_v16 = vadd.f32 %v1649_v43, %v928_v12 }
  0xec   :  { %v949_v17 = vadd.f32 %v1649_v43, %v881_v13  ;;  %v965_v18 = vadd.f32 %v1649_v43, %v897_v14 }
  0xed   :  { %vm1044_vm14 = vcmp.ge.f32.partialorder %v980_v15, 0.0  ;;  %v1112_v19 = vmul.f32 %v1655_v45, %v980_v15  ;;  %vm1060_vm15 = vcmp.ge.f32.partialorder %v996_v16, 0.0  ;;  %v1128_v20 = vmul.f32 %v1655_v45, %v996_v16 }
  0xee   :  { %vm1013_vm0 = vcmp.ge.f32.partialorder %v949_v17, 0.0  ;;  %v1081_v21 = vmul.f32 %v1655_v45, %v949_v17  ;;  %vm1029_vm1 = vcmp.ge.f32.partialorder %v965_v18, 0.0  ;;  %v1097_v22 = vmul.f32 %v1655_v45, %v965_v18 }
  0xef   :  { %v1176_v25 = vsel %vm1044_vm14, %v980_v15, %v1112_v19  ;;  %v1192_v26 = vsel %vm1060_vm15, %v996_v16, %v1128_v20 }
  0xf0   :  { %v614_v23 = vpop.f32.mrf.mxu2  ;;  %v654_v24 = vpop.f32.mrf.mxu3  ;;  %1240 = vst [vmem:[#allocation7 + $0x138] sm:$0xff] %v1176_v25  ;;  %v1145_v29 = vsel %vm1013_vm0, %v949_v17, %v1081_v21  ;;  %v1161_v30 = vsel %vm1029_vm1, %v965_v18, %v1097_v22 }
  0xf1   :  { %v536_v27 = vpop.f32.mrf.mxu0  ;;  %v576_v28 = vpop.f32.mrf.mxu1  ;;  %1256 = vst [vmem:[#allocation7 + $0x1b8] sm:$0xff] %v1192_v26  ;;  %v913_v31 = vmul.f32 %v1644_v40, %v614_v23  ;;  %v929_v32 = vmul.f32 %v1644_v40, %v654_v24 }
  0xf2   :  { %1209 = vst [vmem:[#allocation7 + $0x40] sm:$0xff] %v1145_v29  ;;  %v882_v33 = vmul.f32 %v1644_v40, %v536_v27  ;;  %v898_v34 = vmul.f32 %v1644_v40, %v576_v28 }
  0xf3   :  { %1225 = vst [vmem:[#allocation7 + $0xc0] sm:$0xff] %v1161_v30  ;;  %v981_v35 = vadd.f32 %v1649_v43, %v913_v31  ;;  %v997_v36 = vadd.f32 %v1649_v43, %v929_v32 }
  0xf4   :  { %v950_v37 = vadd.f32 %v1649_v43, %v882_v33  ;;  %v966_v38 = vadd.f32 %v1649_v43, %v898_v34 }
  0xf5   :  { %vm1045_vm2 = vcmp.ge.f32.partialorder %v981_v35, 0.0  ;;  %v1113_v39 = vmul.f32 %v1655_v45, %v981_v35  ;;  %vm1061_vm3 = vcmp.ge.f32.partialorder %v997_v36, 0.0  ;;  %v1129_v41 = vmul.f32 %v1655_v45, %v997_v36 }
  0xf6   :  { %vm1014_vm4 = vcmp.ge.f32.partialorder %v950_v37, 0.0  ;;  %v1082_v42 = vmul.f32 %v1655_v45, %v950_v37  ;;  %vm1030_vm5 = vcmp.ge.f32.partialorder %v966_v38, 0.0  ;;  %v1098_v44 = vmul.f32 %v1655_v45, %v966_v38 }
  0xf7   :  { %v1177_v48 = vsel %vm1045_vm2, %v981_v35, %v1113_v39  ;;  %v1193_v49 = vsel %vm1061_vm3, %v997_v36, %v1129_v41 }
  0xf8   :  { %v616_v46 = vpop.f32.mrf.mxu2  ;;  %v656_v47 = vpop.f32.mrf.mxu3  ;;  %1241 = vst [vmem:[#allocation7 + $0x140] sm:$0xff] %v1177_v48  ;;  %v1146_v52 = vsel %vm1014_vm4, %v950_v37, %v1082_v42  ;;  %v1162_v53 = vsel %vm1030_vm5, %v966_v38, %v1098_v44 }
  0xf9   :  { %v539_v50 = vpop.f32.mrf.mxu0  ;;  %v579_v51 = vpop.f32.mrf.mxu1  ;;  %1257 = vst [vmem:[#allocation7 + $0x1c0] sm:$0xff] %v1193_v49  ;;  %v914_v54 = vmul.f32 %v1644_v40, %v616_v46  ;;  %v930_v55 = vmul.f32 %v1644_v40, %v656_v47 }
  0xfa   :  { %1210 = vst [vmem:[#allocation7 + $0x48] sm:$0xff] %v1146_v52  ;;  %v883_v56 = vmul.f32 %v1644_v40, %v539_v50  ;;  %v899_v57 = vmul.f32 %v1644_v40, %v579_v51 }
  0xfb   :  { %1226 = vst [vmem:[#allocation7 + $0xc8] sm:$0xff] %v1162_v53  ;;  %v982_v58 = vadd.f32 %v1649_v43, %v914_v54  ;;  %v998_v59 = vadd.f32 %v1649_v43, %v930_v55 }
  0xfc   :  { %v951_v60 = vadd.f32 %v1649_v43, %v883_v56  ;;  %v967_v61 = vadd.f32 %v1649_v43, %v899_v57 }
  0xfd   :  { %vm1046_vm6 = vcmp.ge.f32.partialorder %v982_v58, 0.0  ;;  %v1114_v62 = vmul.f32 %v1655_v45, %v982_v58  ;;  %vm1062_vm7 = vcmp.ge.f32.partialorder %v998_v59, 0.0  ;;  %v1130_v63 = vmul.f32 %v1655_v45, %v998_v59 }
  0xfe   :  { %vm1015_vm8 = vcmp.ge.f32.partialorder %v951_v60, 0.0  ;;  %v1083_v0 = vmul.f32 %v1655_v45, %v951_v60  ;;  %vm1031_vm9 = vcmp.ge.f32.partialorder %v967_v61, 0.0  ;;  %v1099_v1 = vmul.f32 %v1655_v45, %v967_v61 }
  0xff   :  { %v1178_v4 = vsel %vm1046_vm6, %v982_v58, %v1114_v62  ;;  %v1194_v5 = vsel %vm1062_vm7, %v998_v59, %v1130_v63 }
 0x100   :  { %v619_v2 = vpop.f32.mrf.mxu2  ;;  %v659_v3 = vpop.f32.mrf.mxu3  ;;  %1242 = vst [vmem:[#allocation7 + $0x148] sm:$0xff] %v1178_v4  ;;  %v1147_v8 = vsel %vm1015_vm8, %v951_v60, %v1083_v0  ;;  %v1163_v9 = vsel %vm1031_vm9, %v967_v61, %v1099_v1 }
 0x101   :  { %v541_v6 = vpop.f32.mrf.mxu0  ;;  %v581_v7 = vpop.f32.mrf.mxu1  ;;  %1258 = vst [vmem:[#allocation7 + $0x1c8] sm:$0xff] %v1194_v5  ;;  %v915_v10 = vmul.f32 %v1644_v40, %v619_v2  ;;  %v931_v11 = vmul.f32 %v1644_v40, %v659_v3 }
 0x102   :  { %1211 = vst [vmem:[#allocation7 + $0x50] sm:$0xff] %v1147_v8  ;;  %v884_v12 = vmul.f32 %v1644_v40, %v541_v6  ;;  %v900_v13 = vmul.f32 %v1644_v40, %v581_v7 }
 0x103   :  { %1227 = vst [vmem:[#allocation7 + $0xd0] sm:$0xff] %v1163_v9  ;;  %v983_v14 = vadd.f32 %v1649_v43, %v915_v10  ;;  %v999_v15 = vadd.f32 %v1649_v43, %v931_v11 }
 0x104   :  { %v952_v16 = vadd.f32 %v1649_v43, %v884_v12  ;;  %v968_v17 = vadd.f32 %v1649_v43, %v900_v13 }
 0x105   :  { %vm1047_vm10 = vcmp.ge.f32.partialorder %v983_v14, 0.0  ;;  %v1115_v18 = vmul.f32 %v1655_v45, %v983_v14  ;;  %vm1063_vm11 = vcmp.ge.f32.partialorder %v999_v15, 0.0  ;;  %v1131_v19 = vmul.f32 %v1655_v45, %v999_v15 }
 0x106   :  { %vm1016_vm12 = vcmp.ge.f32.partialorder %v952_v16, 0.0  ;;  %v1084_v20 = vmul.f32 %v1655_v45, %v952_v16  ;;  %vm1032_vm13 = vcmp.ge.f32.partialorder %v968_v17, 0.0  ;;  %v1100_v21 = vmul.f32 %v1655_v45, %v968_v17 }
 0x107   :  { %v1179_v24 = vsel %vm1047_vm10, %v983_v14, %v1115_v18  ;;  %v1195_v25 = vsel %vm1063_vm11, %v999_v15, %v1131_v19 }
 0x108   :  { %v621_v22 = vpop.f32.mrf.mxu2  ;;  %v661_v23 = vpop.f32.mrf.mxu3  ;;  %1243 = vst [vmem:[#allocation7 + $0x150] sm:$0xff] %v1179_v24  ;;  %v1148_v28 = vsel %vm1016_vm12, %v952_v16, %v1084_v20  ;;  %v1164_v29 = vsel %vm1032_vm13, %v968_v17, %v1100_v21 }
 0x109   :  { %v544_v26 = vpop.f32.mrf.mxu0  ;;  %v584_v27 = vpop.f32.mrf.mxu1  ;;  %1259 = vst [vmem:[#allocation7 + $0x1d0] sm:$0xff] %v1195_v25  ;;  %v916_v30 = vmul.f32 %v1644_v40, %v621_v22  ;;  %v932_v31 = vmul.f32 %v1644_v40, %v661_v23 }
 0x10a   :  { %1212 = vst [vmem:[#allocation7 + $0x58] sm:$0xff] %v1148_v28  ;;  %v885_v32 = vmul.f32 %v1644_v40, %v544_v26  ;;  %v901_v33 = vmul.f32 %v1644_v40, %v584_v27 }
 0x10b   :  { %1228 = vst [vmem:[#allocation7 + $0xd8] sm:$0xff] %v1164_v29  ;;  %v984_v34 = vadd.f32 %v1649_v43, %v916_v30  ;;  %v1000_v35 = vadd.f32 %v1649_v43, %v932_v31 }
 0x10c   :  { %v953_v36 = vadd.f32 %v1649_v43, %v885_v32  ;;  %v969_v37 = vadd.f32 %v1649_v43, %v901_v33 }
 0x10d   :  { %vm1048_vm14 = vcmp.ge.f32.partialorder %v984_v34, 0.0  ;;  %v1116_v38 = vmul.f32 %v1655_v45, %v984_v34  ;;  %vm1064_vm15 = vcmp.ge.f32.partialorder %v1000_v35, 0.0  ;;  %v1132_v39 = vmul.f32 %v1655_v45, %v1000_v35 }
 0x10e   :  { %vm1017_vm0 = vcmp.ge.f32.partialorder %v953_v36, 0.0  ;;  %v1085_v41 = vmul.f32 %v1655_v45, %v953_v36  ;;  %vm1033_vm1 = vcmp.ge.f32.partialorder %v969_v37, 0.0  ;;  %v1101_v42 = vmul.f32 %v1655_v45, %v969_v37 }
 0x10f   :  { %v1180_v47 = vsel %vm1048_vm14, %v984_v34, %v1116_v38  ;;  %v1196_v48 = vsel %vm1064_vm15, %v1000_v35, %v1132_v39 }
 0x110   :  { %v624_v44 = vpop.f32.mrf.mxu2  ;;  %v664_v46 = vpop.f32.mrf.mxu3  ;;  %1244 = vst [vmem:[#allocation7 + $0x158] sm:$0xff] %v1180_v47  ;;  %v1149_v51 = vsel %vm1017_vm0, %v953_v36, %v1085_v41  ;;  %v1165_v52 = vsel %vm1033_vm1, %v969_v37, %v1101_v42 }
 0x111   :  { %v546_v49 = vpop.f32.mrf.mxu0  ;;  %v586_v50 = vpop.f32.mrf.mxu1  ;;  %1260 = vst [vmem:[#allocation7 + $0x1d8] sm:$0xff] %v1196_v48  ;;  %v917_v53 = vmul.f32 %v1644_v40, %v624_v44  ;;  %v933_v54 = vmul.f32 %v1644_v40, %v664_v46 }
 0x112   :  { %1213 = vst [vmem:[#allocation7 + $0x60] sm:$0xff] %v1149_v51  ;;  %v886_v55 = vmul.f32 %v1644_v40, %v546_v49  ;;  %v902_v56 = vmul.f32 %v1644_v40, %v586_v50 }
 0x113   :  { %1229 = vst [vmem:[#allocation7 + $0xe0] sm:$0xff] %v1165_v52  ;;  %v985_v57 = vadd.f32 %v1649_v43, %v917_v53  ;;  %v1001_v58 = vadd.f32 %v1649_v43, %v933_v54 }
 0x114   :  { %v954_v59 = vadd.f32 %v1649_v43, %v886_v55  ;;  %v970_v60 = vadd.f32 %v1649_v43, %v902_v56 }
 0x115   :  { %vm1049_vm2 = vcmp.ge.f32.partialorder %v985_v57, 0.0  ;;  %v1117_v61 = vmul.f32 %v1655_v45, %v985_v57  ;;  %vm1065_vm3 = vcmp.ge.f32.partialorder %v1001_v58, 0.0  ;;  %v1133_v62 = vmul.f32 %v1655_v45, %v1001_v58 }
 0x116   :  { %vm1018_vm4 = vcmp.ge.f32.partialorder %v954_v59, 0.0  ;;  %v1086_v63 = vmul.f32 %v1655_v45, %v954_v59  ;;  %vm1034_vm5 = vcmp.ge.f32.partialorder %v970_v60, 0.0  ;;  %v1102_v0 = vmul.f32 %v1655_v45, %v970_v60 }
 0x117   :  { %v1181_v3 = vsel %vm1049_vm2, %v985_v57, %v1117_v61  ;;  %v1197_v4 = vsel %vm1065_vm3, %v1001_v58, %v1133_v62 }
 0x118   :  { %v626_v1 = vpop.f32.mrf.mxu2  ;;  %v666_v2 = vpop.f32.mrf.mxu3  ;;  %1245 = vst [vmem:[#allocation7 + $0x160] sm:$0xff] %v1181_v3  ;;  %v1150_v7 = vsel %vm1018_vm4, %v954_v59, %v1086_v63  ;;  %v1166_v8 = vsel %vm1034_vm5, %v970_v60, %v1102_v0 }
 0x119   :  { %v549_v5 = vpop.f32.mrf.mxu0  ;;  %v589_v6 = vpop.f32.mrf.mxu1  ;;  %1261 = vst [vmem:[#allocation7 + $0x1e0] sm:$0xff] %v1197_v4  ;;  %v918_v9 = vmul.f32 %v1644_v40, %v626_v1  ;;  %v934_v10 = vmul.f32 %v1644_v40, %v666_v2 }
 0x11a   :  { %1214 = vst [vmem:[#allocation7 + $0x68] sm:$0xff] %v1150_v7  ;;  %v887_v11 = vmul.f32 %v1644_v40, %v549_v5  ;;  %v903_v12 = vmul.f32 %v1644_v40, %v589_v6 }
 0x11b   :  { %1230 = vst [vmem:[#allocation7 + $0xe8] sm:$0xff] %v1166_v8  ;;  %v986_v13 = vadd.f32 %v1649_v43, %v918_v9  ;;  %v1002_v14 = vadd.f32 %v1649_v43, %v934_v10 }
 0x11c   :  { %v955_v15 = vadd.f32 %v1649_v43, %v887_v11  ;;  %v971_v16 = vadd.f32 %v1649_v43, %v903_v12 }
 0x11d   :  { %vm1050_vm6 = vcmp.ge.f32.partialorder %v986_v13, 0.0  ;;  %v1118_v17 = vmul.f32 %v1655_v45, %v986_v13  ;;  %vm1066_vm7 = vcmp.ge.f32.partialorder %v1002_v14, 0.0  ;;  %v1134_v18 = vmul.f32 %v1655_v45, %v1002_v14 }
 0x11e   :  { %vm1019_vm8 = vcmp.ge.f32.partialorder %v955_v15, 0.0  ;;  %v1087_v19 = vmul.f32 %v1655_v45, %v955_v15  ;;  %vm1035_vm9 = vcmp.ge.f32.partialorder %v971_v16, 0.0  ;;  %v1103_v20 = vmul.f32 %v1655_v45, %v971_v16 }
 0x11f   :  { %v1182_v23 = vsel %vm1050_vm6, %v986_v13, %v1118_v17  ;;  %v1198_v24 = vsel %vm1066_vm7, %v1002_v14, %v1134_v18 }
 0x120   :  { %v629_v21 = vpop.f32.mrf.mxu2  ;;  %v669_v22 = vpop.f32.mrf.mxu3  ;;  %1246 = vst [vmem:[#allocation7 + $0x168] sm:$0xff] %v1182_v23  ;;  %v1151_v27 = vsel %vm1019_vm8, %v955_v15, %v1087_v19  ;;  %v1167_v28 = vsel %vm1035_vm9, %v971_v16, %v1103_v20 }
 0x121   :  { %v551_v25 = vpop.f32.mrf.mxu0  ;;  %v591_v26 = vpop.f32.mrf.mxu1  ;;  %1262 = vst [vmem:[#allocation7 + $0x1e8] sm:$0xff] %v1198_v24  ;;  %v919_v29 = vmul.f32 %v1644_v40, %v629_v21  ;;  %v935_v30 = vmul.f32 %v1644_v40, %v669_v22 }
 0x122   :  { %1215 = vst [vmem:[#allocation7 + $0x70] sm:$0xff] %v1151_v27  ;;  %v888_v31 = vmul.f32 %v1644_v40, %v551_v25  ;;  %v904_v32 = vmul.f32 %v1644_v40, %v591_v26 }
 0x123   :  { %1231 = vst [vmem:[#allocation7 + $0xf0] sm:$0xff] %v1167_v28  ;;  %v987_v33 = vadd.f32 %v1649_v43, %v919_v29  ;;  %v1003_v34 = vadd.f32 %v1649_v43, %v935_v30 }
 0x124   :  { %v956_v35 = vadd.f32 %v1649_v43, %v888_v31  ;;  %v972_v36 = vadd.f32 %v1649_v43, %v904_v32 }
 0x125   :  { %vm1051_vm10 = vcmp.ge.f32.partialorder %v987_v33, 0.0  ;;  %v1119_v37 = vmul.f32 %v1655_v45, %v987_v33  ;;  %vm1067_vm11 = vcmp.ge.f32.partialorder %v1003_v34, 0.0  ;;  %v1135_v38 = vmul.f32 %v1655_v45, %v1003_v34 }
 0x126   :  { %vm1020_vm12 = vcmp.ge.f32.partialorder %v956_v35, 0.0  ;;  %v1088_v39 = vmul.f32 %v1655_v45, %v956_v35  ;;  %vm1036_vm13 = vcmp.ge.f32.partialorder %v972_v36, 0.0  ;;  %v1104_v41 = vmul.f32 %v1655_v45, %v972_v36 }
 0x127   :  { %v1183_v46 = vsel %vm1051_vm10, %v987_v33, %v1119_v37  ;;  %v1199_v47 = vsel %vm1067_vm11, %v1003_v34, %v1135_v38 }
 0x128   :  { %v631_v42 = vpop.f32.mrf.mxu2  ;;  %v671_v44 = vpop.f32.mrf.mxu3  ;;  %1247 = vst [vmem:[#allocation7 + $0x170] sm:$0xff] %v1183_v46  ;;  %v1152_v48 = vsel %vm1020_vm12, %v956_v35, %v1088_v39  ;;  %v1168_v49 = vsel %vm1036_vm13, %v972_v36, %v1104_v41 }
 0x129   :  { %1263 = vst [vmem:[#allocation7 + $0x1f0] sm:$0xff] %v1199_v47  ;;  %v920_v50 = vmul.f32 %v1644_v40, %v631_v42  ;;  %v936_v51 = vmul.f32 %v1644_v40, %v671_v44 }
 0x12a   :  { %1216 = vst [vmem:[#allocation7 + $0x78] sm:$0xff] %v1152_v48 }
 0x12b   :  { %1232 = vst [vmem:[#allocation7 + $0xf8] sm:$0xff] %v1168_v49  ;;  %v988_v52 = vadd.f32 %v1649_v43, %v920_v50  ;;  %v1004_v53 = vadd.f32 %v1649_v43, %v936_v51 }
 0x12d   :  { %vm1052_vm14 = vcmp.ge.f32.partialorder %v988_v52, 0.0  ;;  %v1120_v54 = vmul.f32 %v1655_v45, %v988_v52  ;;  %vm1068_vm15 = vcmp.ge.f32.partialorder %v1004_v53, 0.0  ;;  %v1136_v55 = vmul.f32 %v1655_v45, %v1004_v53 }
 0x12f   :  { %v1184_v40 = vsel %vm1052_vm14, %v988_v52, %v1120_v54  ;;  %v1200_v56 = vsel %vm1068_vm15, %v1004_v53, %v1136_v55 }
 0x130   :  { %1248 = vst [vmem:[#allocation7 + $0x178] sm:$0xff] %v1184_v40 }
 0x131   :  { %1264 = vst [vmem:[#allocation7 + $0x1f8] sm:$0xff] %v1200_v56 }
 0x132   :  { %1277 = dma.vmem_to_hbm [thread:$0]  %s1270_s3, 8192, %s1272_s10, [#allocation4], %s1603_s11, %s1603_s11, %s1604_s12  }
 0x133   :  { %1596 = dma.done.wait [#allocation4], 8192  }
 0x134   :  { %1597 = vsyncadd [#allocation4], 4294959104 }
 0x135   :  { %1282 = vsyncpa [#allocation3], 1 }
 0x136   :  { %1283 = vsyncpa [#allocation6], 1 }
 0x137   :  { %1284 = vsyncpa [#allocation4], 1 }

</bundles_post_ra>
